<compile_context>
chip_gen: v7x
topology: tpu7x:2x2x1
jax: 0.10.0
libtpu: 0.0.40
codegen_flags: <defaults>
</compile_context>

<pallas_src>
import functools
import math

import jax
import jax.numpy as jnp
from jax.experimental import pallas as pl
from jax.experimental.pallas import tpu as pltpu


def _round_up(x: int, m: int) -> int:
    return ((x + m - 1) // m) * m


def _sublane_pack(dtype) -> int:
    # 8 rows per vreg for f32, 16 for bf16, 32 for int8.
    itemsize = jnp.dtype(dtype).itemsize
    return max(1, 4 // itemsize) * 8


def _vmem_budget_bytes() -> int:
    """Usable VMEM budget for this chip generation (capacity minus headroom)."""
    try:
        cap = int(pltpu.get_tpu_info().vmem_capacity_bytes)
    except Exception:
        cap = 64 << 20  # safe default (v7x physical VMEM per TC)
    return max(cap - (12 << 20), 16 << 20)


def _choose_ffn_tile(H: int, F: int, itemsize: int, token_tile: int,
                     budget: int) -> int:
    """Largest 256-multiple tf whose double-buffered weight tiles fit the budget.

    Per step the weight traffic is w13 (H, 2*tf) + w2 (tf, H) = 3*H*tf elems,
    double-buffered by the BlockSpec pipeline -> 6*H*tf*itemsize bytes.
    """
    fixed = (2 * 2 * token_tile * H * itemsize   # x + out tiles, double-buffered
             + token_tile * H * 4)               # f32 accumulator
    avail = budget - fixed
    tf = (avail // (6 * H * itemsize)) // 256 * 256
    tf = max(int(tf), 256)
    tf = min(tf, _round_up(F, 256))
    return tf


def _swiglu_mlp_kernel(x_ref, w13_ref, w2_ref, o_ref, acc_ref, *, tf):
    """One (token_tile, ffn_tile) step of the SwiGLU MLP.

    x_ref  : (TM, H)       token tile (resident across the F axis)
    w13_ref: (H, 2*TF)     fused [w1^T tile | w3^T tile]
    w2_ref : (TF, H)       slice of w2^T
    o_ref  : (TM, H)       output tile (written on last F step)
    acc_ref: (TM, H) f32   scratch accumulator
    """
    f = pl.program_id(1)

    @pl.when(f == 0)
    def _():
        acc_ref[...] = jnp.zeros_like(acc_ref)

    x = x_ref[...]  # native dtype straight to the MXU
    h = jnp.dot(x, w13_ref[...], preferred_element_type=jnp.float32)
    h1 = h[:, :tf]           # static, lane-aligned (tf is a 256 multiple)
    h3 = h[:, tf:]

    # SiLU(h1) * h3 in f32 (sigmoid runs on the EUP slot — free once MXU-bound).
    gated = (h1 * jax.nn.sigmoid(h1)) * h3

    # Partial down-projection over this FFN slice, accumulated in f32.
    acc_ref[...] += jnp.dot(gated.astype(w2_ref.dtype), w2_ref[...],
                            preferred_element_type=jnp.float32)

    @pl.when(f == pl.num_programs(1) - 1)
    def _():
        o_ref[...] = acc_ref[...].astype(o_ref.dtype)


def prepare_moe_weights(w1, w2, w3, *, token_tile=512, vmem_budget_bytes=None):
    """One-time layout change (do at model-load time, NOT per forward call).

    w1, w3: (F, H)  nn.Linear(hidden, ffn).weight
    w2    : (H, F)  nn.Linear(ffn, hidden).weight

    Returns:
      w13t: (H, 2*F_pad)  tile-interleaved [w1^T | w3^T], F zero-padded to tf
      w2t : (F_pad, H)    w2^T with zero-padded rows
      tf  : int           FFN tile chosen from the per-chip VMEM budget
    """
    F, H = w1.shape
    assert w3.shape == (F, H) and w2.shape == (H, F)
    itemsize = jnp.dtype(w1.dtype).itemsize
    budget = vmem_budget_bytes if vmem_budget_bytes is not None else _vmem_budget_bytes()

    tf = _choose_ffn_tile(H, F, itemsize, token_tile, budget)
    f_pad = _round_up(F, tf)
    pad = f_pad - F

    w1p = jnp.pad(w1, ((0, pad), (0, 0))) if pad else w1
    w3p = jnp.pad(w3, ((0, pad), (0, 0))) if pad else w3
    w2p = jnp.pad(w2, ((0, 0), (0, pad))) if pad else w2

    w1t = w1p.T  # (H, F_pad)
    w3t = w3p.T  # (H, F_pad)
    nf = f_pad // tf
    # Interleave per-tile so BlockSpec block f is the contiguous column range
    # [f*2*tf : (f+1)*2*tf] = [w1 tile f | w3 tile f].
    w13t = jnp.concatenate(
        [w1t.reshape(H, nf, 1, tf), w3t.reshape(H, nf, 1, tf)], axis=2
    ).reshape(H, 2 * f_pad)
    w2t = w2p.T  # (F_pad, H)
    return w13t, w2t, tf


def moe_block_sparse_top2_mlp(hidden_states, w13t, w2t, tf, *, token_tile=512):
    """Pallas SwiGLU MLP forward.

    hidden_states: (T, H)
    w13t         : (H, 2*F_pad)  from prepare_moe_weights
    w2t          : (F_pad, H)    from prepare_moe_weights
    tf           : FFN tile returned by prepare_moe_weights
    returns      : (T, H)
    """
    T, H = hidden_states.shape
    Hw, F2 = w13t.shape
    f_pad = F2 // 2
    assert Hw == H and w2t.shape == (f_pad, H) and f_pad % tf == 0

    dtype = hidden_states.dtype
    itemsize = jnp.dtype(dtype).itemsize
    pack = _sublane_pack(dtype)

    # --- token tiling (pad ragged per-expert token counts, slice at the end) ---
    tm = min(_round_up(token_tile, pack), _round_up(T, pack))
    t_pad = _round_up(T, tm)
    x = hidden_states
    if t_pad != T:
        x = jnp.pad(x, ((0, t_pad - T), (0, 0)))

    grid = (t_pad // tm, f_pad // tf)

    # VMEM actually needed by this configuration (+ compiler headroom),
    # clamped to the physical capacity of the current chip.
    vmem_need = (2 * 2 * tm * H * itemsize      # x + out tiles, double-buffered
                 + tm * H * 4                   # f32 accumulator
                 + 2 * 3 * H * tf * itemsize    # w13 + w2 tiles, double-buffered
                 + (4 << 20))                   # headroom
    try:
        cap = int(pltpu.get_tpu_info().vmem_capacity_bytes)
    except Exception:
        cap = 64 << 20
    vmem_limit = int(min(max(vmem_need, 16 << 20), cap))

    kernel = functools.partial(_swiglu_mlp_kernel, tf=tf)

    out = pl.pallas_call(
        kernel,
        out_shape=jax.ShapeDtypeStruct((t_pad, H), dtype),
        grid_spec=pltpu.PrefetchScalarGridSpec(
            num_scalar_prefetch=0,
            grid=grid,
            in_specs=[
                pl.BlockSpec((tm, H), lambda i, f: (i, 0)),       # x tile (resident over f)
                pl.BlockSpec((H, 2 * tf), lambda i, f: (0, f)),   # [w1^T | w3^T] tile f
                pl.BlockSpec((tf, H), lambda i, f: (f, 0)),       # w2^T slice
            ],
            out_specs=pl.BlockSpec((tm, H), lambda i, f: (i, 0)),
            scratch_shapes=[pltpu.VMEM((tm, H), jnp.float32)],
        ),
        compiler_params=pltpu.CompilerParams(
            dimension_semantics=("parallel", "arbitrary"),
            vmem_limit_bytes=vmem_limit,
        ),
    )(x, w13t, w2t)
    return out[:T]


def _reference(hidden_states, w1, w2, w3):
    """Pure-JAX reference matching the PyTorch forward exactly."""
    h1 = hidden_states @ w1.T
    h3 = hidden_states @ w3.T
    gated = (h1 * jax.nn.sigmoid(h1)) * h3        # SiLU(w1(x)) * w3(x)
    return gated @ w2.T


if __name__ == "__main__":
    # Small, module-consistent shapes:
    #   num_tokens = 16, hidden_size = 32, intermediate_size = 64, act = silu
    T, H, F = 16, 32, 64
    key = jax.random.PRNGKey(0)
    kx, k1, k2, k3 = jax.random.split(key, 4)

    dtype = jnp.float32
    x = jax.random.normal(kx, (T, H), dtype=dtype)
    # nn.Linear-like scaled init, bias=False per module.
    w1 = jax.random.normal(k1, (F, H), dtype=dtype) * (1.0 / H ** 0.5)
    w2 = jax.random.normal(k2, (H, F), dtype=dtype) * (1.0 / F ** 0.5)
    w3 = jax.random.normal(k3, (F, H), dtype=dtype) * (1.0 / H ** 0.5)

    # One-time weight layout prep (model-load time), then the Pallas forward.
    w13t, w2t, tf = prepare_moe_weights(w1, w2, w3)
    out = moe_block_sparse_top2_mlp(x, w13t, w2t, tf)
    out = jax.block_until_ready(out)

    ref = _reference(x, w1, w2, w3)
    assert out.shape == (T, H)
    # f32 inputs/weights -> tight tolerance OK; loosen for bf16.
    assert jnp.allclose(out, ref, atol=1e-4, rtol=1e-4), "mismatch vs reference"

    print("KERNEL_OK")
</pallas_src>

<mosaic_0001>
module attributes {stable_mosaic.version = 11 : i64} {
  func.func @_swiglu_mlp_kernel(%arg0: i32, %arg1: i32, %arg2: memref<16x32xf32, #tpu.memory_space<vmem>>, %arg3: memref<32x512xf32, #tpu.memory_space<vmem>>, %arg4: memref<256x32xf32, #tpu.memory_space<vmem>>, %arg5: memref<16x32xf32, #tpu.memory_space<vmem>>, %arg6: memref<16x32xf32, #tpu.memory_space<vmem>>) attributes {dimension_semantics = [#tpu.dimension_semantics<parallel>, #tpu.dimension_semantics<arbitrary>], iteration_bounds = array<i64: 1, 1>, scalar_prefetch = 0 : i64, scratch_operands = 1 : i64, tpu.core_type = #tpu.core_type<tc>, window_params = [{transform_indices = @transform_0, window_bounds = array<i64: 16, 32>}, {transform_indices = @transform_1, window_bounds = array<i64: 32, 512>}, {transform_indices = @transform_2, window_bounds = array<i64: 256, 32>}, {transform_indices = @transform_3, window_bounds = array<i64: 16, 32>}]} {
    %c0_i32 = arith.constant 0 : i32
    %0 = arith.cmpi eq, %arg1, %c0_i32 : i32
    %1 = arith.extui %0 : i1 to i32
    %c0_i32_0 = arith.constant 0 : i32
    %2 = arith.cmpi ne, %1, %c0_i32_0 : i32
    scf.if %2 {
      %cst_14 = arith.constant 0.000000e+00 : f32
      %23 = vector.broadcast %cst_14 : f32 to vector<16x32xf32>
      %c0_15 = arith.constant 0 : index
      %c0_16 = arith.constant 0 : index
      %24 = vector.load %arg6[%c0_15, %c0_16] : memref<16x32xf32, #tpu.memory_space<vmem>>, vector<16x32xf32>
      tpu.vector_store %arg6[%c0_15, %c0_16], %23 {strides = array<i32>} : memref<16x32xf32, #tpu.memory_space<vmem>>, vector<16x32xf32>,
    } else {
    }
    %c0 = arith.constant 0 : index
    %c0_1 = arith.constant 0 : index
    %3 = vector.load %arg2[%c0, %c0_1] : memref<16x32xf32, #tpu.memory_space<vmem>>, vector<16x32xf32>
    %c0_2 = arith.constant 0 : index
    %c0_3 = arith.constant 0 : index
    %4 = vector.load %arg3[%c0_2, %c0_3] : memref<32x512xf32, #tpu.memory_space<vmem>>, vector<32x512xf32>
    %cst = arith.constant dense<0.000000e+00> : vector<16x512xf32>
    %5 = tpu.matmul %3, %4, %cst {dimension_numbers = #tpu.dot_dimension_numbers<[1], [0], [0], [1], [0, 0, 1, 1], [], []>} : vector<16x32xf32>, vector<32x512xf32>, vector<16x512xf32> -> vector<16x512xf32>
    %6 = vector.extract_strided_slice %5 {offsets = [0, 0], sizes = [16, 256], strides = [1, 1]} : vector<16x512xf32> to vector<16x256xf32>
    %7 = vector.extract_strided_slice %5 {offsets = [0, 256], sizes = [16, 256], strides = [1, 1]} : vector<16x512xf32> to vector<16x256xf32>
    %8 = arith.negf %6 : vector<16x256xf32>
    %9 = math.exp %8 : vector<16x256xf32>
    %cst_4 = arith.constant 1.000000e+00 : f32
    %10 = vector.broadcast %cst_4 : f32 to vector<16x256xf32>
    %11 = arith.addf %10, %9 : vector<16x256xf32>
    %12 = arith.divf %10, %11 : vector<16x256xf32>
    %13 = arith.mulf %6, %12 : vector<16x256xf32>
    %14 = arith.mulf %13, %7 : vector<16x256xf32>
    %c0_5 = arith.constant 0 : index
    %c0_6 = arith.constant 0 : index
    %15 = vector.load %arg6[%c0_5, %c0_6] : memref<16x32xf32, #tpu.memory_space<vmem>>, vector<16x32xf32>
    %c0_7 = arith.constant 0 : index
    %c0_8 = arith.constant 0 : index
    %16 = vector.load %arg4[%c0_7, %c0_8] : memref<256x32xf32, #tpu.memory_space<vmem>>, vector<256x32xf32>
    %cst_9 = arith.constant dense<0.000000e+00> : vector<16x32xf32>
    %17 = tpu.matmul %14, %16, %cst_9 {dimension_numbers = #tpu.dot_dimension_numbers<[1], [0], [0], [1], [0, 0, 1, 1], [], []>} : vector<16x256xf32>, vector<256x32xf32>, vector<16x32xf32> -> vector<16x32xf32>
    %18 = arith.addf %15, %17 : vector<16x32xf32>
    %c0_10 = arith.constant 0 : index
    %c0_11 = arith.constant 0 : index
    %19 = vector.load %arg6[%c0_10, %c0_11] : memref<16x32xf32, #tpu.memory_space<vmem>>, vector<16x32xf32>
    tpu.vector_store %arg6[%c0_10, %c0_11], %18 {strides = array<i32>} : memref<16x32xf32, #tpu.memory_space<vmem>>, vector<16x32xf32>,
    %c0_i32_12 = arith.constant 0 : i32
    %20 = arith.cmpi eq, %arg1, %c0_i32_12 : i32
    %21 = arith.extui %20 : i1 to i32
    %c0_i32_13 = arith.constant 0 : i32
    %22 = arith.cmpi ne, %21, %c0_i32_13 : i32
    scf.if %22 {
      %c0_14 = arith.constant 0 : index
      %c0_15 = arith.constant 0 : index
      %23 = vector.load %arg6[%c0_14, %c0_15] : memref<16x32xf32, #tpu.memory_space<vmem>>, vector<16x32xf32>
      %c0_16 = arith.constant 0 : index
      %c0_17 = arith.constant 0 : index
      %24 = vector.load %arg5[%c0_16, %c0_17] : memref<16x32xf32, #tpu.memory_space<vmem>>, vector<16x32xf32>
      tpu.vector_store %arg5[%c0_16, %c0_17], %23 {strides = array<i32>} : memref<16x32xf32, #tpu.memory_space<vmem>>, vector<16x32xf32>,
    } else {
    }
    return
  }
  func.func @transform_0(%arg0: i32, %arg1: i32) -> (i32, i32) {
    %c0_i32 = arith.constant 0 : i32
    %c0_i32_0 = arith.constant 0 : i32
    return %arg0, %c0_i32 : i32, i32
  }
  func.func @transform_1(%arg0: i32, %arg1: i32) -> (i32, i32) {
    %c0_i32 = arith.constant 0 : i32
    %c0_i32_0 = arith.constant 0 : i32
    return %c0_i32, %arg1 : i32, i32
  }
  func.func @transform_2(%arg0: i32, %arg1: i32) -> (i32, i32) {
    %c0_i32 = arith.constant 0 : i32
    %c0_i32_0 = arith.constant 0 : i32
    return %arg1, %c0_i32 : i32, i32
  }
  func.func @transform_3(%arg0: i32, %arg1: i32) -> (i32, i32) {
    %c0_i32 = arith.constant 0 : i32
    %c0_i32_0 = arith.constant 0 : i32
    return %arg0, %c0_i32 : i32, i32
  }
}

</mosaic_0001>

<bundles_post_ra>
// kernel: tpu_custom_call.1
= control target key start
LH: loop header
LB: loop body
LE: loop exit
PB: predicated region body
PF: predicated region fallthrough
CT: control target
= control target key end

     0   :  { %vm19_vm0 = vcmask 261120   ;;  %v507_v7 = vmov 0.0   ;;  %s703_s0 = inlined_call_operand.vmem [shape: f32[16,32], index: 0, kind: input, shape index: {}]   ;;  %s704_s1 = inlined_call_operand.vmem [shape: f32[32,512], index: 1, kind: input, shape index: {}]   ;;  %s705_s2 = inlined_call_operand.vmem [shape: f32[256,32], index: 2, kind: input, shape index: {}]   ;;  %s706_s3 = inlined_call_operand.hbm [shape: f32[16,32], index: 3, kind: output, shape index: {}]  }
   0x1   :  { %v25_v0 = vld [vmem:[%s704_s1 + $0x8] sm:$0xff]  ;;  %v24_v2 = vld [vmem:[%s704_s1] sm:$0xff]  ;;  %111 = vmatprep.mubr.f32.mxu1 %v507_v7  ;;  %20 = vst.msk [vmem:[#allocation2] sm:$0xff] %vm19_vm0, %v507_v7  ;;  %21 = vst.msk [vmem:[#allocation2 + $0x8] sm:$0xff] %vm19_vm0, %v507_v7 }
   0x2   :  { %v29_v1 = vld [vmem:[%s704_s1 + $0x28] sm:$0xff]  ;;  %v28_v4 = vld [vmem:[%s704_s1 + $0x20] sm:$0xff]  ;;  %v27_v12 = vld [vmem:[%s704_s1 + $0x18] sm:$0xff] }
   0x3   :  { %v415_v3 = vpack.c.bf16 %v29_v1, %v25_v0  ;;  %v33_v5 = vld [vmem:[%s704_s1 + $0x48] sm:$0xff]  ;;  %v417_v8 = vpack.c.bf16 %v28_v4, %v24_v2  ;;  %v32_v10 = vld [vmem:[%s704_s1 + $0x40] sm:$0xff]  ;;  %v31_v13 = vld [vmem:[%s704_s1 + $0x38] sm:$0xff] }
   0x4   :  { %v37_v6 = vld [vmem:[%s704_s1 + $0x68] sm:$0xff]  ;;  %v36_v11 = vld [vmem:[%s704_s1 + $0x60] sm:$0xff]  ;;  %v423_v15 = vpack.c.bf16 %v31_v13, %v27_v12  ;;  %v26_v16 = vld [vmem:[%s704_s1 + $0x10] sm:$0xff] }
   0x5   :  { %v419_v9 = vpack.c.bf16 %v37_v6, %v33_v5  ;;  %416 = vmatprep.subr.bf16.mxu1 %v415_v3  ;;  %v421_v14 = vpack.c.bf16 %v36_v11, %v32_v10  ;;  %v30_v17 = vld [vmem:[%s704_s1 + $0x30] sm:$0xff]  ;;  %v35_v18 = vld [vmem:[%s704_s1 + $0x58] sm:$0xff] }
   0x6   :  { %418 = vmatpush1.bf16.msra.mxu1 %v417_v8  ;;  %v39_v19 = vld [vmem:[%s704_s1 + $0x78] sm:$0xff] }
   0x7   :  { %420 = vmatprep.subr.bf16.mxu1 %v419_v9 }
   0x8   :  { %8 = vsyncpa [#allocation4], 0  ;;  %v22_v20 = vld [vmem:[%s703_s0] sm:$0xff]  ;;  %v425_v21 = vpack.c.bf16 %v30_v17, %v26_v16  ;;  %v427_v22 = vpack.c.bf16 %v39_v19, %v35_v18  ;;  %v34_v23 = vld [vmem:[%s704_s1 + $0x50] sm:$0xff] }
   0x9   :  { %v38_v24 = vld [vmem:[%s704_s1 + $0x70] sm:$0xff]  ;;  %v23_v25 = vld [vmem:[%s703_s0 + $0x8] sm:$0xff]  ;;  %v251_v27 = vld [vmem:[%s705_s2 + $0x80] sm:$0xff] }
   0xa   :  { %422 = vmatpush1.bf16.msra.mxu1 %v421_v14  ;;  %v429_v26 = vpack.c.bf16 %v38_v24, %v34_v23  ;;  %v252_v28 = vld [vmem:[%s705_s2 + $0x88] sm:$0xff]  ;;  %v235_v30 = vld [vmem:[%s705_s2] sm:$0xff]  ;;  %v253_v33 = vld [vmem:[%s705_s2 + $0x90] sm:$0xff] }
   0xb   :  { %424 = vmatprep.subr.bf16.mxu1 %v423_v15  ;;  %v431_v29 = vpack.c.bf16 %v252_v28, %v251_v27  ;;  %v236_v31 = vld [vmem:[%s705_s2 + $0x8] sm:$0xff]  ;;  %v254_v34 = vld [vmem:[%s705_s2 + $0x98] sm:$0xff]  ;;  %v237_v36 = vld [vmem:[%s705_s2 + $0x10] sm:$0xff] }
   0xc   :  { %v433_v32 = vpack.c.bf16 %v236_v31, %v235_v30  ;;  %v435_v35 = vpack.c.bf16 %v254_v34, %v253_v33  ;;  %v238_v37 = vld [vmem:[%s705_s2 + $0x18] sm:$0xff]  ;;  %v255_v39 = vld [vmem:[%s705_s2 + $0xa0] sm:$0xff]  ;;  %v256_v40 = vld [vmem:[%s705_s2 + $0xa8] sm:$0xff] }
   0xd   :  { %369 = vmatmul.mubr.msk.f32.vlgmr.msra.gmra.mrb[0].mxu1 %vm19_vm0, %v22_v20  ;;  %432 = vmatprep.subr.bf16.mxu0 %v431_v29  ;;  %v437_v38 = vpack.c.bf16 %v238_v37, %v237_v36  ;;  %v439_v41 = vpack.c.bf16 %v256_v40, %v255_v39  ;;  %v239_v42 = vld [vmem:[%s705_s2 + $0x20] sm:$0xff]  ;;  %v240_v43 = vld [vmem:[%s705_s2 + $0x28] sm:$0xff]  ;;  %v257_v45 = vld [vmem:[%s705_s2 + $0xb0] sm:$0xff] }
   0xe   :  { %117 = vmatprep.mubr.f32.mxu1 %v507_v7  ;;  %426 = vmatpush1.bf16.msra.mxu1 %v425_v21  ;;  %v441_v44 = vpack.c.bf16 %v240_v43, %v239_v42  ;;  %v258_v46 = vld [vmem:[%s705_s2 + $0xb8] sm:$0xff]  ;;  %v241_v48 = vld [vmem:[%s705_s2 + $0x30] sm:$0xff]  ;;  %v259_v51 = vld [vmem:[%s705_s2 + $0xc0] sm:$0xff] }
   0xf   :  { %428 = vmatprep.subr.bf16.mxu1 %v427_v22  ;;  %434 = vmatpush3.bf16.msra.mxu0 %v433_v32  ;;  %v443_v47 = vpack.c.bf16 %v258_v46, %v257_v45  ;;  %v242_v49 = vld [vmem:[%s705_s2 + $0x38] sm:$0xff]  ;;  %v260_v52 = vld [vmem:[%s705_s2 + $0xc8] sm:$0xff]  ;;  %v243_v54 = vld [vmem:[%s705_s2 + $0x40] sm:$0xff] }
  0x10   :  { %436 = vmatprep.subr.bf16.mxu0 %v435_v35  ;;  %v445_v50 = vpack.c.bf16 %v242_v49, %v241_v48  ;;  %v447_v53 = vpack.c.bf16 %v260_v52, %v259_v51  ;;  %v244_v55 = vld [vmem:[%s705_s2 + $0x48] sm:$0xff]  ;;  %v261_v57 = vld [vmem:[%s705_s2 + $0xd0] sm:$0xff]  ;;  %v262_v58 = vld [vmem:[%s705_s2 + $0xd8] sm:$0xff] }
  0x11   :  { %370 = vmatmul.mubr.msk.f32.gmra.mrb[2].mxu1 %vm19_vm0, %v23_v25  ;;  %v449_v56 = vpack.c.bf16 %v244_v55, %v243_v54  ;;  %v451_v59 = vpack.c.bf16 %v262_v58, %v261_v57  ;;  %v245_v60 = vld [vmem:[%s705_s2 + $0x50] sm:$0xff]  ;;  %v246_v61 = vld [vmem:[%s705_s2 + $0x58] sm:$0xff]  ;;  %v263_v63 = vld [vmem:[%s705_s2 + $0xe0] sm:$0xff] }
  0x12   :  { %430 = vmatpush1.bf16.msra.mxu1 %v429_v26  ;;  %188 = vmatprep.mubr.f32.mxu1 %v507_v7  ;;  %v453_v62 = vpack.c.bf16 %v246_v61, %v245_v60  ;;  %v264_v0 = vld [vmem:[%s705_s2 + $0xe8] sm:$0xff]  ;;  %v247_v2 = vld [vmem:[%s705_s2 + $0x60] sm:$0xff]  ;;  %v265_v5 = vld [vmem:[%s705_s2 + $0xf0] sm:$0xff] }
  0x13   :  { %438 = vmatpush3.bf16.msra.mxu0 %v437_v38  ;;  %v455_v1 = vpack.c.bf16 %v264_v0, %v263_v63  ;;  %v248_v3 = vld [vmem:[%s705_s2 + $0x68] sm:$0xff]  ;;  %v266_v6 = vld [vmem:[%s705_s2 + $0xf8] sm:$0xff]  ;;  %v249_v8 = vld [vmem:[%s705_s2 + $0x70] sm:$0xff] }
  0x14   :  { %440 = vmatprep.subr.bf16.mxu0 %v439_v41  ;;  %v457_v4 = vpack.c.bf16 %v248_v3, %v247_v2  ;;  %v250_v9 = vld [vmem:[%s705_s2 + $0x78] sm:$0xff]  ;;  %v234_v49 = vld [vmem:[#allocation2 + $0x8] sm:$0xff]  ;;  %s508_s2 = smov [#allocation3]  }
  0x15   :  { %371 = vmatmul.mubr.msk.f32.vlgmr.msra.gmra.mrb[4].mxu1 %vm19_vm0, %v22_v20  ;;  %v461_v10 = vpack.c.bf16 %v250_v9, %v249_v8  ;;  %s358_s25 = sshll.u32 %s508_s2, 4  ;;  %s359_s25 = int_to_ptr.vmem [resolvable:$true] %s358_s25 }
  0x16   :  { %194 = vmatprep.mubr.f32.mxu1 %v507_v7  ;;  %v459_v7 = vpack.c.bf16 %v266_v6, %v265_v5  ;;  %s483_s26 = scalar_lea.vmem %s359_s25, 256  ;;  %p488_p1 = scmp.lt.s32.totalorder %s359_s25, %s359_s25 }
  0x17   :  { %442 = vmatpush3.bf16.msra.mxu0 %v441_v44  ;;  %v233_v44 = vld [vmem:[#allocation2] sm:$0xff]  ;;  %p484_p0 = scmp.ne.s32.totalorder %s359_s25, %s483_s26  ;;  %p489_p2 = scmp.lt.s32.totalorder %s483_s26, %s483_s26 }
  0x18   :  { %444 = vmatprep.subr.bf16.mxu0 %v443_v47 }
  0x19   :  { %372 = vmatmul.mubr.msk.f32.gmra.mrb[6].mxu1 %vm19_vm0, %v23_v25  ;;  %p490_p3 = por %p489_p2, %p488_p1 }
  0x1b   :  { %446 = vmatpush3.bf16.msra.mxu0 %v445_v50  ;;  %p491_p4 = pnand %p490_p3, %p484_p0 }
  0x1c   :  { %448 = vmatprep.subr.bf16.mxu0 %v447_v53 }
  0x1f   :  { %450 = vmatpush3.bf16.msra.mxu0 %v449_v56 }
  0x20   :  { %452 = vmatprep.subr.bf16.mxu0 %v451_v59 }
  0x23   :  { %454 = vmatpush3.bf16.msra.mxu0 %v453_v62 }
  0x24   :  { %456 = vmatprep.subr.bf16.mxu0 %v455_v1 }
  0x27   :  { %458 = vmatpush3.bf16.msra.mxu0 %v457_v4 }
  0x28   :  { %460 = vmatprep.subr.bf16.mxu0 %v459_v7 }
  0x2b   :  { %462 = vmatpush3.bf16.msra.mxu0 %v461_v10 }
  0xe0   :  { %v113_v11 = vpop.f32.mrb[0].mxu1 }
  0xe1   :  { %v373_v12 = vmul.f32 -1.442695, %v113_v11  ;;  %v115_v13 = vpop.f32.mrb[1].mxu1 }
  0xe2   :  { %v374_v14 = vmul.f32 -1.442695, %v115_v13 }
  0xe3   :  { %467 = vpow2.f32 %v373_v12 }
  0xe4   :  { %469 = vpow2.f32 %v374_v14  ;;  %v119_v15 = vpop.f32.mrb[2].mxu1 }
  0xe5   :  { %v375_v16 = vmul.f32 -1.442695, %v119_v15  ;;  %v121_v17 = vpop.f32.mrb[3].mxu1 }
  0xe6   :  { %v376_v18 = vmul.f32 -1.442695, %v121_v17 }
  0xe7   :  { %471 = vpow2.f32 %v375_v16 }
  0xe8   :  { %473 = vpow2.f32 %v376_v18  ;;  %v190_v19 = vpop.f32.mrb[4].mxu1 }
  0xe9   :  { %v192_v20 = vpop.f32.mrb[5].mxu1 }
  0xec   :  { %v196_v21 = vpop.f32.mrb[6].mxu1 }
  0xed   :  { %v468_v22 = vpop.eup %467  ;;  %v198_v23 = vpop.f32.mrb[7].mxu1 }
  0xee   :  { %v470_v24 = vpop.eup %469  ;;  %v213_v25 = vadd.f32 1.0, %v468_v22 }
  0xef   :  { %v214_v26 = vadd.f32 1.0, %v470_v24 }
  0xf0   :  { %475 = vrcp.f32 %v213_v25 }
  0xf1   :  { %v472_v27 = vpop.eup %471  ;;  %477 = vrcp.f32 %v214_v26 }
  0xf2   :  { %v474_v28 = vpop.eup %473  ;;  %v215_v29 = vadd.f32 1.0, %v472_v27 }
  0xf3   :  { %v216_v30 = vadd.f32 1.0, %v474_v28 }
  0xf4   :  { %479 = vrcp.f32 %v215_v29 }
  0xf5   :  { %481 = vrcp.f32 %v216_v30 }
  0xfa   :  { %v476_v31 = vpop.eup %475 }
  0xfb   :  { %v478_v32 = vpop.eup %477  ;;  %v225_v33 = vmul.f32 %v476_v31, %v113_v11 }
  0xfc   :  { %v226_v34 = vmul.f32 %v478_v32, %v115_v13 }
  0xfd   :  { %v229_v35 = vmul.f32 %v225_v33, %v190_v19 }
  0xfe   :  { %v480_v36 = vpop.eup %479  ;;  %v230_v37 = vmul.f32 %v226_v34, %v192_v20 }
  0xff   :  { %v482_v38 = vpop.eup %481  ;;  %v227_v39 = vmul.f32 %v480_v36, %v119_v15 }
 0x100   :  { %v228_v40 = vmul.f32 %v482_v38, %v121_v17  ;;  %331 = vmatprep.mubr.f32.mxu0 %v230_v37 }
 0x101   :  { %v231_v41 = vmul.f32 %v227_v39, %v196_v21  ;;  %332 = vmatmul.mubr.f32.vlgmr.msra.gmra.mrb[0].mxu0 %v229_v35 }
 0x102   :  { %v232_v42 = vmul.f32 %v228_v40, %v198_v23 }
 0x104   :  { %336 = vmatprep.mubr.f32.mxu0 %v232_v42 }
 0x105   :  { %337 = vmatmul.mubr.f32.gmra.mrb[2].mxu0 %v231_v41 }
 0x1d4   :  { %v409_v43 = vpop.f32.mrb[0].mxu0 }
 0x1d5   :  { %v410_v45 = vpop.f32.mrb[1].mxu0 }
 0x1d6   :  { %v411_v46 = vadd.f32 %v410_v45, %v409_v43 }
 0x1d8   :  { %v342_v47 = vadd.f32 %v411_v46, %v233_v44  ;;  %v412_v48 = vpop.f32.mrb[2].mxu0 }
 0x1d9   :  { %v413_v50 = vpop.f32.mrb[3].mxu0 }
 0x1da   :  { %344 = vst.msk [vmem:[#allocation2] sm:$0xff] %vm19_vm0, %v342_v47  ;;  %v414_v51 = vadd.f32 %v413_v50, %v412_v48 }
 0x1dc   :  { %v343_v52 = vadd.f32 %v414_v51, %v234_v49 }
 0x1de   :  { %345 = vst.msk [vmem:[#allocation2 + $0x8] sm:$0xff] %vm19_vm0, %v343_v52 }
 0x1e1   :  { %v349_v53 = vld [vmem:[#allocation2] sm:$0xff] }
 0x1e2   :  { %351 = vst.msk [vmem:[#allocation3] sm:$0xff] %vm19_vm0, %v349_v53 }
 0x1e5   :  { %v350_v54 = vld [vmem:[#allocation2 + $0x8] sm:$0xff] }
 0x1e6   :  { %352 = vst.msk [vmem:[#allocation3 + $0x8] sm:$0xff] %vm19_vm0, %v350_v54 }
 0x1e7   :  { %494 = shalt.err (!%p491_p4)
}
 0x1e8   :  { %s495_s29 = scalar_lea.hbm %s706_s3, 256 }
 0x1e9   :  { %p496_p5 = scmp.ne.s32.totalorder %s706_s3, %s495_s29  ;;  %p499_p6 = scmp.lt.u32.totalorder %s495_s29, %s706_s3 }
 0x1eb   :  { %p501_p7 = pnand %p499_p6, %p496_p5 }
 0x1ed   :  { %504 = shalt.err (!%p501_p7)
}
 0x1ee   :  { %s509_s7 = smov 128   ;;  %s510_s8 = smov 8  }
 0x1ef   :  { %364 = dma.vmem_to_hbm [thread:$0]  %s359_s25, 256, %s706_s3, [#allocation4], %s509_s7, %s509_s7, %s510_s8  }
 0x1f0   :  { %505 = dma.done.wait [#allocation4], 256  }
 0x1f1   :  { %506 = vsyncadd [#allocation4], 4294967040 }
 0x1f2   :  { %368 = vsyncpa [#allocation4], 1 }

</bundles_post_ra>
